<compile_context>
chip_gen: v5e
topology: v5e:2x2
jax: 0.10.0
libtpu: 0.0.40
codegen_flags: <defaults>
</compile_context>

<pallas_src>
import jax
import jax.numpy as jnp
import numpy as np
from jax.experimental import pallas as pl
from jax.experimental.pallas import tpu as pltpu


# --------------------------------------------------------------------------
# Kernel
# --------------------------------------------------------------------------
def _complex_projection_kernel(
    x_img_ref, x_txt_ref, conj_ref,
    w1i_ref, b1i_ref, w2i_ref, b2i_ref,
    w1t_ref, b1t_ref, w2t_ref, b2t_ref,
    concat_ref, x1_ref, x2_ref,
):
    mm_dtype = w1i_ref.dtype  # bf16 (MXU-native) by default

    # ---- image branch: (BN folded into w1i/b1i) -> Linear -> Dropout(id) -> ReLU -> Linear
    hi = jnp.dot(x_img_ref[...].astype(mm_dtype), w1i_ref[...],
                 preferred_element_type=jnp.float32) + b1i_ref[...]
    hi = jnp.maximum(hi, 0.0)
    x1 = jnp.dot(hi.astype(mm_dtype), w2i_ref[...],
                 preferred_element_type=jnp.float32) + b2i_ref[...]
    x1_ref[...] = x1                      # store early: shrink live range

    # ---- text branch: (BN folded into w1t/b1t) -> Linear -> ReLU -> Linear
    ht = jnp.dot(x_txt_ref[...].astype(mm_dtype), w1t_ref[...],
                 preferred_element_type=jnp.float32) + b1t_ref[...]
    ht = jnp.maximum(ht, 0.0)
    x2 = jnp.dot(ht.astype(mm_dtype), w2t_ref[...],
                 preferred_element_type=jnp.float32) + b2t_ref[...]
    x2_ref[...] = x2                      # store early

    # ---- complex projection: two lane-aligned slice stores, re-half first
    D = x1.shape[-1]
    concat_ref[:, :D] = x1 * jnp.cos(x2)                      # re_score
    concat_ref[:, D:] = x1 * (conj_ref[...] * jnp.sin(x2))    # im_score


# --------------------------------------------------------------------------
# Parameters
# --------------------------------------------------------------------------
def init_params(key, image_dim, text_dim):
    """Raw, module-like parameters (BN affine + two Linear layers per branch)."""
    ks = jax.random.split(key, 12)

    def linear(kw, kb, fan_in, fan_out):
        bound = 1.0 / np.sqrt(fan_in)
        w = jax.random.uniform(kw, (fan_in, fan_out), jnp.float32, -bound, bound)
        b = jax.random.uniform(kb, (1, fan_out), jnp.float32, -bound, bound)
        return w, b

    gamma_i = 1.0 + 0.1 * jax.random.normal(ks[0], (1, image_dim), jnp.float32)
    beta_i = 0.1 * jax.random.normal(ks[1], (1, image_dim), jnp.float32)
    gamma_t = 1.0 + 0.1 * jax.random.normal(ks[2], (1, text_dim), jnp.float32)
    beta_t = 0.1 * jax.random.normal(ks[3], (1, text_dim), jnp.float32)

    w1i, b1i = linear(ks[4], ks[5], image_dim, image_dim)
    w2i, b2i = linear(ks[6], ks[7], image_dim, image_dim)
    w1t, b1t = linear(ks[8], ks[9], text_dim, image_dim)
    w2t, b2t = linear(ks[10], ks[11], image_dim, image_dim)

    return dict(gamma_i=gamma_i, beta_i=beta_i, gamma_t=gamma_t, beta_t=beta_t,
                w1i=w1i, b1i=b1i, w2i=w2i, b2i=b2i,
                w1t=w1t, b1t=b1t, w2t=w2t, b2t=b2t)


def prepare_params(raw, eps=1e-5, mm_dtype=jnp.bfloat16):
    """Fold eval-mode BN (running mean=0, var=1) into W1/b1; cast weights to mm_dtype.

    BN(x) = gamma * x / sqrt(1+eps) + beta, so
        BN(x) @ W1 + b1 = x @ (diag(gamma/sqrt(1+eps)) @ W1) + (beta @ W1 + b1).
    The fold is done in f32 (mathematically exact), then weights are cast to
    the MXU input dtype; biases stay f32.
    """
    inv_std = np.float32(1.0 / np.sqrt(1.0 + eps))
    s_i = (raw["gamma_i"] * inv_std).reshape(-1, 1)      # (Di, 1)
    s_t = (raw["gamma_t"] * inv_std).reshape(-1, 1)      # (Dt, 1)

    w1i = (s_i * raw["w1i"]).astype(mm_dtype)
    b1i = (raw["beta_i"] @ raw["w1i"] + raw["b1i"]).astype(jnp.float32)
    w1t = (s_t * raw["w1t"]).astype(mm_dtype)
    b1t = (raw["beta_t"] @ raw["w1t"] + raw["b1t"]).astype(jnp.float32)

    return dict(w1i=w1i, b1i=b1i,
                w2i=raw["w2i"].astype(mm_dtype), b2i=raw["b2i"].astype(jnp.float32),
                w1t=w1t, b1t=b1t,
                w2t=raw["w2t"].astype(mm_dtype), b2t=raw["b2t"].astype(jnp.float32))


# --------------------------------------------------------------------------
# Wrapper
# --------------------------------------------------------------------------
def complex_projection(x_img, x_txt, conjugate, params):
    B, Di = x_img.shape
    Dt = x_txt.shape[1]
    D = params["w2i"].shape[1]

    conj = conjugate[:B].reshape(B, 1).astype(jnp.float32)   # CONJUGATE[:num_samples]

    # Batch tile: one tile if B <= 256 (block == full dims is always legal),
    # otherwise 256 rows (MXU-friendly on v6e/v7x, multiple of 8 for v5e).
    TB = B if B <= 256 else 256
    grid = (pl.cdiv(B, TB),)

    def row_spec(cols):
        return pl.BlockSpec((TB, cols), lambda i: (i, 0))

    def const_spec(shape):
        return pl.BlockSpec(shape, lambda i: (0, 0))    # weights stay resident

    inputs = (
        x_img, x_txt, conj,
        params["w1i"], params["b1i"], params["w2i"], params["b2i"],
        params["w1t"], params["b1t"], params["w2t"], params["b2t"],
    )
    in_specs = [
        row_spec(Di), row_spec(Dt), row_spec(1),
        const_spec(params["w1i"].shape), const_spec(params["b1i"].shape),
        const_spec(params["w2i"].shape), const_spec(params["b2i"].shape),
        const_spec(params["w1t"].shape), const_spec(params["b1t"].shape),
        const_spec(params["w2t"].shape), const_spec(params["b2t"].shape),
    ]

    out_shapes = (
        jax.ShapeDtypeStruct((B, 2 * D), jnp.float32),  # concat_x  (re | im)
        jax.ShapeDtypeStruct((B, D), jnp.float32),      # x1
        jax.ShapeDtypeStruct((B, D), jnp.float32),      # x2
    )
    out_specs = [row_spec(2 * D), row_spec(D), row_spec(D)]

    # VMEM budget: weights + biases resident, activations/outputs double-buffered.
    weight_bytes = sum(params[k].nbytes for k in ("w1i", "w2i", "w1t", "w2t"))
    bias_bytes = sum(params[k].nbytes for k in ("b1i", "b2i", "b1t", "b2t"))
    act_bytes = TB * (Di + Dt + 1) * 4
    out_bytes = TB * 4 * D * 4
    vmem_est = 2 * (weight_bytes + bias_bytes + act_bytes + out_bytes) + (1 << 20)
    vmem_limit = None if vmem_est <= 14 * 1024 * 1024 else int(min(vmem_est, 48 * 1024 * 1024))
    # TODO(synk): for very large image_dim (weights > ~48 MiB, notably on v7x's
    # 64 MiB VMEM) add a K-reduction grid axis with a pl.when-init accumulator
    # instead of holding full DxD weights resident.

    cost = pl.CostEstimate(
        flops=int(2 * B * D * (Di + Dt + 2 * D)),
        transcendentals=int(2 * B * D),
        bytes_accessed=int(x_img.nbytes + x_txt.nbytes + conj.nbytes
                           + weight_bytes + bias_bytes + 4 * B * D * 4),
    )

    concat_x, x1, x2 = pl.pallas_call(
        _complex_projection_kernel,
        out_shape=out_shapes,
        grid_spec=pltpu.PrefetchScalarGridSpec(
            num_scalar_prefetch=0,
            grid=grid,
            in_specs=in_specs,
            out_specs=out_specs,
        ),
        compiler_params=pltpu.CompilerParams(
            dimension_semantics=("parallel",),
            vmem_limit_bytes=vmem_limit,
        ),
        cost_estimate=cost,
    )(*inputs)

    # Glue (no compute): re/im are views of concat_x, unsqueeze(1), x0copy.
    re_score = concat_x[:, :D]
    im_score = concat_x[:, D:]
    x0copy = x_img[:, None, :]
    return (concat_x, x1[:, None, :], x2[:, None, :], x0copy,
            re_score[:, None, :], im_score[:, None, :])


# --------------------------------------------------------------------------
# References
# --------------------------------------------------------------------------
def reference_prepared(x_img, x_txt, conjugate, params):
    """Same math as the kernel (folded params, same matmul input dtype)."""
    mm = params["w1i"].dtype
    hi = jnp.maximum(jnp.dot(x_img.astype(mm), params["w1i"],
                             preferred_element_type=jnp.float32) + params["b1i"], 0.0)
    x1 = jnp.dot(hi.astype(mm), params["w2i"],
                 preferred_element_type=jnp.float32) + params["b2i"]
    ht = jnp.maximum(jnp.dot(x_txt.astype(mm), params["w1t"],
                             preferred_element_type=jnp.float32) + params["b1t"], 0.0)
    x2 = jnp.dot(ht.astype(mm), params["w2t"],
                 preferred_element_type=jnp.float32) + params["b2t"]
    conj = conjugate[:x_img.shape[0]].reshape(-1, 1).astype(jnp.float32)
    re = x1 * jnp.cos(x2)
    im = x1 * (conj * jnp.sin(x2))
    concat_x = jnp.concatenate([re, im], axis=1)
    return (concat_x, x1[:, None, :], x2[:, None, :], x_img[:, None, :],
            re[:, None, :], im[:, None, :])


def reference_module_f32(x_img, x_txt, conjugate, raw, eps=1e-5):
    """Exact eval-mode PyTorch module semantics, full f32 (no BN fold, no bf16)."""
    inv_std = np.float32(1.0 / np.sqrt(1.0 + eps))
    xi = raw["gamma_i"] * x_img * inv_std + raw["beta_i"]
    hi = jnp.maximum(xi @ raw["w1i"] + raw["b1i"], 0.0)
    x1 = hi @ raw["w2i"] + raw["b2i"]
    xt = raw["gamma_t"] * x_txt * inv_std + raw["beta_t"]
    ht = jnp.maximum(xt @ raw["w1t"] + raw["b1t"], 0.0)
    x2 = ht @ raw["w2t"] + raw["b2t"]
    conj = conjugate[:x_img.shape[0]].reshape(-1, 1)
    re = x1 * jnp.cos(x2)
    im = x1 * (conj * jnp.sin(x2))
    concat_x = jnp.concatenate([re, im], axis=1)
    return (concat_x, x1[:, None, :], x2[:, None, :], x_img[:, None, :],
            re[:, None, :], im[:, None, :])


# --------------------------------------------------------------------------
# Test
# --------------------------------------------------------------------------
if __name__ == "__main__":
    B, IMG_D, TXT_D = 8, 128, 256
    key = jax.random.PRNGKey(0)
    kx, kt, kc, kp = jax.random.split(key, 4)

    x_img = jax.random.normal(kx, (B, IMG_D), jnp.float32)
    x_txt = jax.random.normal(kt, (B, TXT_D), jnp.float32)
    # CONJUGATE: +/-1 column vector, deliberately longer than the batch
    # (the module slices CONJUGATE[:num_samples]).
    conjugate = jnp.where(
        jax.random.bernoulli(kc, 0.5, (B + 4, 1)), 1.0, -1.0
    ).astype(jnp.float32)

    raw = init_params(kp, IMG_D, TXT_D)
    params = prepare_params(raw, mm_dtype=jnp.bfloat16)

    outs = complex_projection(x_img, x_txt, conjugate, params)
    outs = jax.block_until_ready(outs)

    # 1) Tight check against a reference using the same folded params /
    #    MXU input precision as the kernel.
    refs = reference_prepared(x_img, x_txt, conjugate, params)
    for got, exp in zip(outs, refs):
        np.testing.assert_allclose(np.asarray(got), np.asarray(exp),
                                   rtol=1e-4, atol=1e-4)

    # 2) Loose check against the exact f32 eval-mode module (bf16 MXU inputs
    #    introduce ~1% error at these magnitudes).
    refs_f32 = reference_module_f32(x_img, x_txt, conjugate, raw)
    for got, exp in zip(outs, refs_f32):
        np.testing.assert_allclose(np.asarray(got), np.asarray(exp),
                                   rtol=5e-2, atol=5e-2)

    print("KERNEL_OK")
</pallas_src>

<mosaic_0001>
module attributes {stable_mosaic.version = 11 : i64} {
  func.func @_complex_projection_kernel(%arg0: i32, %arg1: memref<8x128xf32, #tpu.memory_space<vmem>>, %arg2: memref<8x256xf32, #tpu.memory_space<vmem>>, %arg3: memref<8x1xf32, #tpu.memory_space<vmem>>, %arg4: memref<128x128xbf16, #tpu.memory_space<vmem>>, %arg5: memref<1x128xf32, #tpu.memory_space<vmem>>, %arg6: memref<128x128xbf16, #tpu.memory_space<vmem>>, %arg7: memref<1x128xf32, #tpu.memory_space<vmem>>, %arg8: memref<256x128xbf16, #tpu.memory_space<vmem>>, %arg9: memref<1x128xf32, #tpu.memory_space<vmem>>, %arg10: memref<128x128xbf16, #tpu.memory_space<vmem>>, %arg11: memref<1x128xf32, #tpu.memory_space<vmem>>, %arg12: memref<8x256xf32, #tpu.memory_space<vmem>>, %arg13: memref<8x128xf32, #tpu.memory_space<vmem>>, %arg14: memref<8x128xf32, #tpu.memory_space<vmem>>) attributes {dimension_semantics = [#tpu.dimension_semantics<parallel>], iteration_bounds = array<i64: 1>, scalar_prefetch = 0 : i64, scratch_operands = 0 : i64, tpu.core_type = #tpu.core_type<tc>, window_params = [{transform_indices = @transform_0, window_bounds = array<i64: 8, 128>}, {transform_indices = @transform_1, window_bounds = array<i64: 8, 256>}, {transform_indices = @transform_2, window_bounds = array<i64: 8, 1>}, {pipeline_mode = #tpu.pipeline_mode<synchronous>, transform_indices = @transform_3, window_bounds = array<i64: 128, 128>}, {pipeline_mode = #tpu.pipeline_mode<synchronous>, transform_indices = @transform_4, window_bounds = array<i64: 1, 128>}, {pipeline_mode = #tpu.pipeline_mode<synchronous>, transform_indices = @transform_5, window_bounds = array<i64: 128, 128>}, {pipeline_mode = #tpu.pipeline_mode<synchronous>, transform_indices = @transform_6, window_bounds = array<i64: 1, 128>}, {pipeline_mode = #tpu.pipeline_mode<synchronous>, transform_indices = @transform_7, window_bounds = array<i64: 256, 128>}, {pipeline_mode = #tpu.pipeline_mode<synchronous>, transform_indices = @transform_8, window_bounds = array<i64: 1, 128>}, {pipeline_mode = #tpu.pipeline_mode<synchronous>, transform_indices = @transform_9, window_bounds = array<i64: 128, 128>}, {pipeline_mode = #tpu.pipeline_mode<synchronous>, transform_indices = @transform_10, window_bounds = array<i64: 1, 128>}, {transform_indices = @transform_11, window_bounds = array<i64: 8, 256>}, {transform_indices = @transform_12, window_bounds = array<i64: 8, 128>}, {transform_indices = @transform_13, window_bounds = array<i64: 8, 128>}]} {
    %c0 = arith.constant 0 : index
    %c0_0 = arith.constant 0 : index
    %0 = vector.load %arg1[%c0, %c0_0] : memref<8x128xf32, #tpu.memory_space<vmem>>, vector<8x128xf32>
    %1 = arith.truncf %0 : vector<8x128xf32> to vector<8x128xbf16>
    %c0_1 = arith.constant 0 : index
    %c0_2 = arith.constant 0 : index
    %2 = vector.load %arg4[%c0_1, %c0_2] : memref<128x128xbf16, #tpu.memory_space<vmem>>, vector<128x128xbf16>
    %cst = arith.constant dense<0.000000e+00> : vector<8x128xf32>
    %3 = tpu.matmul %1, %2, %cst {dimension_numbers = #tpu.dot_dimension_numbers<[1], [0], [0], [1], [0, 0, 1, 1], [], []>} : vector<8x128xbf16>, vector<128x128xbf16>, vector<8x128xf32> -> vector<8x128xf32>
    %c0_3 = arith.constant 0 : index
    %c0_4 = arith.constant 0 : index
    %4 = vector.load %arg5[%c0_3, %c0_4] : memref<1x128xf32, #tpu.memory_space<vmem>>, vector<1x128xf32>
    %5 = vector.broadcast %4 : vector<1x128xf32> to vector<8x128xf32>
    %6 = arith.addf %3, %5 : vector<8x128xf32>
    %cst_5 = arith.constant 0.000000e+00 : f32
    %7 = vector.broadcast %cst_5 : f32 to vector<8x128xf32>
    %8 = arith.maximumf %6, %7 : vector<8x128xf32>
    %9 = arith.truncf %8 : vector<8x128xf32> to vector<8x128xbf16>
    %c0_6 = arith.constant 0 : index
    %c0_7 = arith.constant 0 : index
    %10 = vector.load %arg6[%c0_6, %c0_7] : memref<128x128xbf16, #tpu.memory_space<vmem>>, vector<128x128xbf16>
    %cst_8 = arith.constant dense<0.000000e+00> : vector<8x128xf32>
    %11 = tpu.matmul %9, %10, %cst_8 {dimension_numbers = #tpu.dot_dimension_numbers<[1], [0], [0], [1], [0, 0, 1, 1], [], []>} : vector<8x128xbf16>, vector<128x128xbf16>, vector<8x128xf32> -> vector<8x128xf32>
    %c0_9 = arith.constant 0 : index
    %c0_10 = arith.constant 0 : index
    %12 = vector.load %arg7[%c0_9, %c0_10] : memref<1x128xf32, #tpu.memory_space<vmem>>, vector<1x128xf32>
    %13 = vector.broadcast %12 : vector<1x128xf32> to vector<8x128xf32>
    %14 = arith.addf %11, %13 : vector<8x128xf32>
    %c0_11 = arith.constant 0 : index
    %c0_12 = arith.constant 0 : index
    %15 = vector.load %arg13[%c0_11, %c0_12] : memref<8x128xf32, #tpu.memory_space<vmem>>, vector<8x128xf32>
    tpu.vector_store %arg13[%c0_11, %c0_12], %14 {strides = array<i32>} : memref<8x128xf32, #tpu.memory_space<vmem>>, vector<8x128xf32>,
    %c0_13 = arith.constant 0 : index
    %c0_14 = arith.constant 0 : index
    %16 = vector.load %arg2[%c0_13, %c0_14] : memref<8x256xf32, #tpu.memory_space<vmem>>, vector<8x256xf32>
    %17 = arith.truncf %16 : vector<8x256xf32> to vector<8x256xbf16>
    %c0_15 = arith.constant 0 : index
    %c0_16 = arith.constant 0 : index
    %18 = vector.load %arg8[%c0_15, %c0_16] : memref<256x128xbf16, #tpu.memory_space<vmem>>, vector<256x128xbf16>
    %cst_17 = arith.constant dense<0.000000e+00> : vector<8x128xf32>
    %19 = tpu.matmul %17, %18, %cst_17 {dimension_numbers = #tpu.dot_dimension_numbers<[1], [0], [0], [1], [0, 0, 1, 1], [], []>} : vector<8x256xbf16>, vector<256x128xbf16>, vector<8x128xf32> -> vector<8x128xf32>
    %c0_18 = arith.constant 0 : index
    %c0_19 = arith.constant 0 : index
    %20 = vector.load %arg9[%c0_18, %c0_19] : memref<1x128xf32, #tpu.memory_space<vmem>>, vector<1x128xf32>
    %21 = vector.broadcast %20 : vector<1x128xf32> to vector<8x128xf32>
    %22 = arith.addf %19, %21 : vector<8x128xf32>
    %cst_20 = arith.constant 0.000000e+00 : f32
    %23 = vector.broadcast %cst_20 : f32 to vector<8x128xf32>
    %24 = arith.maximumf %22, %23 : vector<8x128xf32>
    %25 = arith.truncf %24 : vector<8x128xf32> to vector<8x128xbf16>
    %c0_21 = arith.constant 0 : index
    %c0_22 = arith.constant 0 : index
    %26 = vector.load %arg10[%c0_21, %c0_22] : memref<128x128xbf16, #tpu.memory_space<vmem>>, vector<128x128xbf16>
    %cst_23 = arith.constant dense<0.000000e+00> : vector<8x128xf32>
    %27 = tpu.matmul %25, %26, %cst_23 {dimension_numbers = #tpu.dot_dimension_numbers<[1], [0], [0], [1], [0, 0, 1, 1], [], []>} : vector<8x128xbf16>, vector<128x128xbf16>, vector<8x128xf32> -> vector<8x128xf32>
    %c0_24 = arith.constant 0 : index
    %c0_25 = arith.constant 0 : index
    %28 = vector.load %arg11[%c0_24, %c0_25] : memref<1x128xf32, #tpu.memory_space<vmem>>, vector<1x128xf32>
    %29 = vector.broadcast %28 : vector<1x128xf32> to vector<8x128xf32>
    %30 = arith.addf %27, %29 : vector<8x128xf32>
    %c0_26 = arith.constant 0 : index
    %c0_27 = arith.constant 0 : index
    %31 = vector.load %arg14[%c0_26, %c0_27] : memref<8x128xf32, #tpu.memory_space<vmem>>, vector<8x128xf32>
    tpu.vector_store %arg14[%c0_26, %c0_27], %30 {strides = array<i32>} : memref<8x128xf32, #tpu.memory_space<vmem>>, vector<8x128xf32>,
    %32 = math.cos %30 : vector<8x128xf32>
    %33 = arith.mulf %14, %32 : vector<8x128xf32>
    %c0_28 = arith.constant 0 : index
    %c0_29 = arith.constant 0 : index
    %34 = vector.load %arg12[%c0_28, %c0_29] : memref<8x256xf32, #tpu.memory_space<vmem>>, vector<8x128xf32>
    tpu.vector_store %arg12[%c0_28, %c0_29], %33 {strides = array<i32>} : memref<8x256xf32, #tpu.memory_space<vmem>>, vector<8x128xf32>,
    %c0_30 = arith.constant 0 : index
    %c0_31 = arith.constant 0 : index
    %35 = vector.load %arg3[%c0_30, %c0_31] : memref<8x1xf32, #tpu.memory_space<vmem>>, vector<8x1xf32>
    %36 = math.sin %30 : vector<8x128xf32>
    %37 = vector.broadcast %35 : vector<8x1xf32> to vector<8x128xf32>
    %38 = arith.mulf %37, %36 : vector<8x128xf32>
    %39 = arith.mulf %14, %38 : vector<8x128xf32>
    %c0_32 = arith.constant 0 : index
    %c128 = arith.constant 128 : index
    %40 = vector.load %arg12[%c0_32, %c128] : memref<8x256xf32, #tpu.memory_space<vmem>>, vector<8x128xf32>
    tpu.vector_store %arg12[%c0_32, %c128], %39 {strides = array<i32>} : memref<8x256xf32, #tpu.memory_space<vmem>>, vector<8x128xf32>,
    return
  }
  func.func @transform_0(%arg0: i32) -> (i32, i32) {
    %c0_i32 = arith.constant 0 : i32
    %c0_i32_0 = arith.constant 0 : i32
    return %arg0, %c0_i32 : i32, i32
  }
  func.func @transform_1(%arg0: i32) -> (i32, i32) {
    %c0_i32 = arith.constant 0 : i32
    %c0_i32_0 = arith.constant 0 : i32
    return %arg0, %c0_i32 : i32, i32
  }
  func.func @transform_2(%arg0: i32) -> (i32, i32) {
    %c0_i32 = arith.constant 0 : i32
    %c0_i32_0 = arith.constant 0 : i32
    return %arg0, %c0_i32 : i32, i32
  }
  func.func @transform_3(%arg0: i32) -> (i32, i32) {
    %c0_i32 = arith.constant 0 : i32
    %c0_i32_0 = arith.constant 0 : i32
    %c0_i32_1 = arith.constant 0 : i32
    return %c0_i32, %c0_i32_0 : i32, i32
  }
  func.func @transform_4(%arg0: i32) -> (i32, i32) {
    %c0_i32 = arith.constant 0 : i32
    %c0_i32_0 = arith.constant 0 : i32
    %c0_i32_1 = arith.constant 0 : i32
    return %c0_i32, %c0_i32_0 : i32, i32
  }
  func.func @transform_5(%arg0: i32) -> (i32, i32) {
    %c0_i32 = arith.constant 0 : i32
    %c0_i32_0 = arith.constant 0 : i32
    %c0_i32_1 = arith.constant 0 : i32
    return %c0_i32, %c0_i32_0 : i32, i32
  }
  func.func @transform_6(%arg0: i32) -> (i32, i32) {
    %c0_i32 = arith.constant 0 : i32
    %c0_i32_0 = arith.constant 0 : i32
    %c0_i32_1 = arith.constant 0 : i32
    return %c0_i32, %c0_i32_0 : i32, i32
  }
  func.func @transform_7(%arg0: i32) -> (i32, i32) {
    %c0_i32 = arith.constant 0 : i32
    %c0_i32_0 = arith.constant 0 : i32
    %c0_i32_1 = arith.constant 0 : i32
    return %c0_i32, %c0_i32_0 : i32, i32
  }
  func.func @transform_8(%arg0: i32) -> (i32, i32) {
    %c0_i32 = arith.constant 0 : i32
    %c0_i32_0 = arith.constant 0 : i32
    %c0_i32_1 = arith.constant 0 : i32
    return %c0_i32, %c0_i32_0 : i32, i32
  }
  func.func @transform_9(%arg0: i32) -> (i32, i32) {
    %c0_i32 = arith.constant 0 : i32
    %c0_i32_0 = arith.constant 0 : i32
    %c0_i32_1 = arith.constant 0 : i32
    return %c0_i32, %c0_i32_0 : i32, i32
  }
  func.func @transform_10(%arg0: i32) -> (i32, i32) {
    %c0_i32 = arith.constant 0 : i32
    %c0_i32_0 = arith.constant 0 : i32
    %c0_i32_1 = arith.constant 0 : i32
    return %c0_i32, %c0_i32_0 : i32, i32
  }
  func.func @transform_11(%arg0: i32) -> (i32, i32) {
    %c0_i32 = arith.constant 0 : i32
    %c0_i32_0 = arith.constant 0 : i32
    return %arg0, %c0_i32 : i32, i32
  }
  func.func @transform_12(%arg0: i32) -> (i32, i32) {
    %c0_i32 = arith.constant 0 : i32
    %c0_i32_0 = arith.constant 0 : i32
    return %arg0, %c0_i32 : i32, i32
  }
  func.func @transform_13(%arg0: i32) -> (i32, i32) {
    %c0_i32 = arith.constant 0 : i32
    %c0_i32_0 = arith.constant 0 : i32
    return %arg0, %c0_i32 : i32, i32
  }
}

</mosaic_0001>

<bundles_post_ra>
// kernel: tpu_custom_call.1
= control target key start
LH: loop header
LB: loop body
LE: loop exit
PB: predicated region body
PF: predicated region fallthrough
CT: control target
= control target key end

     0   :  { %19 = vsyncpa [#allocation3], 0  ;;  %s1528_s0 = inlined_call_operand.vmem [shape: f32[8,128], index: 0, kind: input, shape index: {}]   ;;  %s1529_s1 = inlined_call_operand.hbm [shape: f32[8,256], index: 1, kind: input, shape index: {}]   ;;  %s1530_s2 = inlined_call_operand.vmem [shape: f32[8,1], index: 2, kind: input, shape index: {}]   ;;  %s1531_s3 = inlined_call_operand.hbm [shape: bf16[128,128], index: 3, kind: input, shape index: {}]   ;;  %s1532_s4 = inlined_call_operand.vmem [shape: f32[1,128], index: 4, kind: input, shape index: {}]   ;;  %s1533_s5 = inlined_call_operand.hbm [shape: bf16[128,128], index: 5, kind: input, shape index: {}]   ;;  %s1534_s6 = inlined_call_operand.vmem [shape: f32[1,128], index: 6, kind: input, shape index: {}]   ;;  %s1535_s7 = inlined_call_operand.hbm [shape: bf16[256,128], index: 7, kind: input, shape index: {}]   ;;  %s1536_s8 = inlined_call_operand.vmem [shape: f32[1,128], index: 8, kind: input, shape index: {}]   ;;  %s1537_s9 = inlined_call_operand.hbm [shape: bf16[128,128], index: 9, kind: input, shape index: {}]   ;;  %s1538_s10 = inlined_call_operand.vmem [shape: f32[1,128], index: 10, kind: input, shape index: {}]   ;;  %s1539_s11 = inlined_call_operand.hbm [shape: f32[8,256], index: 11, kind: output, shape index: {0}]   ;;  %s1540_s12 = inlined_call_operand.hbm [shape: f32[8,128], index: 12, kind: output, shape index: {1}]   ;;  %s1541_s13 = inlined_call_operand.hbm [shape: f32[8,128], index: 13, kind: output, shape index: {2}]  }
   0x1   :  { %20 = vsyncpa [#allocation6], 0 }
   0x2   :  { %21 = vsyncpa [#allocation9], 0 }
   0x3   :  { %22 = vsyncpa [#allocation4], 0  ;;  %s43_s27 = sshll.u32 %s1531_s3, 4  ;;  %s44_s27 = int_to_ptr.hbm [resolvable:$true] %s43_s27 }
   0x4   :  { %23 = vsyncpa [#allocation13], 0  ;;  %s1332_s28 = smov [#allocation5]   ;;  %s73_s15 = sshll.u32 %s1535_s7, 4  ;;  %s74_s15 = int_to_ptr.hbm [resolvable:$true] %s73_s15 }
   0x5   :  { %s45_s29 = sshll.u32 %s1332_s28, 4  ;;  %s1333_s16 = smov 64   ;;  %s46_s29 = int_to_ptr.vmem [resolvable:$true] %s45_s29 }
   0x6   :  { %s1334_s17 = smov 4   ;;  %s1335_s18 = smov [#allocation8]  }
   0x7   :  { %51 = dma.hbm_to_vmem [thread:$0]  %s44_s27, 1024, %s46_s29, [#allocation6], %s1333_s16, %s1333_s16, %s1334_s17  }
   0x8   :  { %s75_s19 = sshll.u32 %s1335_s18, 4  ;;  %s31_s22 = sshll.u32 %s1529_s1, 4  ;;  %s76_s19 = int_to_ptr.vmem [resolvable:$true] %s75_s19  ;;  %s32_s22 = int_to_ptr.hbm [resolvable:$true] %s31_s22 }
   0x9   :  { %81 = dma.hbm_to_vmem [thread:$0]  %s74_s15, 2048, %s76_s19, [#allocation9], %s1333_s16, %s1333_s16, %s1334_s17  }
   0xa   :  { %s58_s24 = sshll.u32 %s1533_s5, 4  ;;  %s1336_s25 = smov [#allocation2]   ;;  %s59_s24 = int_to_ptr.hbm [resolvable:$true] %s58_s24 }
   0xb   :  { %s33_s26 = sshll.u32 %s1336_s25, 4  ;;  %s1337_s7 = smov [#allocation7]   ;;  %s34_s26 = int_to_ptr.vmem [resolvable:$true] %s33_s26 }
   0xc   :  { %36 = dma.hbm_to_vmem [thread:$0]  %s32_s22, 256, %s34_s26, [#allocation3]  }
   0xd   :  { %s60_s27 = sshll.u32 %s1337_s7, 4  ;;  %s88_s30 = sshll.u32 %s1537_s9, 4  ;;  %s61_s27 = int_to_ptr.vmem [resolvable:$true] %s60_s27  ;;  %s89_s30 = int_to_ptr.hbm [resolvable:$true] %s88_s30 }
   0xe   :  { %66 = dma.hbm_to_vmem [thread:$0]  %s59_s24, 1024, %s61_s27, [#allocation6], %s1333_s16, %s1333_s16, %s1334_s17  }
   0xf   :  { %s1338_s1 = smov [#allocation10]  }
  0x10   :  { %s90_s14 = sshll.u32 %s1338_s1, 4  ;;  %s91_s14 = int_to_ptr.vmem [resolvable:$true] %s90_s14 }
  0x11   :  { %96 = dma.hbm_to_vmem [thread:$0]  %s89_s30, 1024, %s91_s14, [#allocation9], %s1333_s16, %s1333_s16, %s1334_s17  }
  0x12   :  { %1322 = dma.done.wait [#allocation3], 256  }
  0x13   :  { %1323 = vsyncadd [#allocation3], 4294967040 }
  0x14   :  { %1324 = dma.done.wait [#allocation6], 2048  }
  0x15   :  { %1325 = vsyncadd [#allocation6], 4294965248 }
  0x16   :  { %1326 = dma.done.wait [#allocation9], 3072  }
  0x17   :  { %1327 = vsyncadd [#allocation9], 4294964224  ;;  %v1091_v0 = vld [vmem:[#allocation8 + $0x38] sm:$0xff]  ;;  %v1090_v2 = vld [vmem:[#allocation8 + $0x30] sm:$0xff]  ;;  %v1339_v40 = vmov 0   ;;  %s1340_s21 = smov [#allocation12]  }
  0x18   :  { %v1099_v1 = vld [vmem:[#allocation8 + $0x78] sm:$0xff]  ;;  %422 = vmatpush.bf16.msra.mxu2 %v1091_v0  ;;  %v1098_v3 = vld [vmem:[#allocation8 + $0x70] sm:$0xff]  ;;  %v1089_v4 = vld [vmem:[#allocation8 + $0x28] sm:$0xff]  ;;  %1125 = vset.pattern.permute.xlu0 %v1339_v40  ;;  %s868_s22 = sshll.u32 %s1340_s21, 4  ;;  %s870_s24 = sshll.u32 %s1540_s12, 4  ;;  %s869_s22 = int_to_ptr.vmem [resolvable:$true] %s868_s22  ;;  %s871_s24 = int_to_ptr.hbm [resolvable:$true] %s870_s24 }
  0x19   :  { %435 = vmatpush.bf16.msra.mxu3 %v1099_v1  ;;  %v1097_v5 = vld [vmem:[#allocation8 + $0x68] sm:$0xff]  ;;  %v1075_v6 = vld [vmem:[#allocation5 + $0x38] sm:$0xff]  ;;  %v1074_v7 = vld [vmem:[#allocation5 + $0x30] sm:$0xff]  ;;  %s1341_s25 = smov [#allocation14]   ;;  %s859_s29 = sshll.u32 %s1539_s11, 4  ;;  %s860_s29 = int_to_ptr.hbm [resolvable:$true] %s859_s29 }
  0x1a   :  { %189 = vmatpush.bf16.msra.mxu0 %v1075_v6  ;;  %v1088_v8 = vld [vmem:[#allocation8 + $0x20] sm:$0xff]  ;;  %v1073_v10 = vld [vmem:[#allocation5 + $0x28] sm:$0xff]  ;;  %v1087_v11 = vld [vmem:[#allocation8 + $0x18] sm:$0xff]  ;;  %s879_s26 = sshll.u32 %s1341_s25, 4  ;;  %s880_s26 = int_to_ptr.vmem [resolvable:$true] %s879_s26 }
  0x1b   :  { %v1096_v9 = vld [vmem:[#allocation8 + $0x60] sm:$0xff]  ;;  %v1095_v12 = vld [vmem:[#allocation8 + $0x58] sm:$0xff]  ;;  %v1086_v14 = vld [vmem:[#allocation8 + $0x10] sm:$0xff] }
  0x1c   :  { %423 = vmatpush.bf16.msra.mxu2 %v1090_v2  ;;  %v1072_v13 = vld [vmem:[#allocation5 + $0x20] sm:$0xff]  ;;  %v1094_v15 = vld [vmem:[#allocation8 + $0x50] sm:$0xff]  ;;  %v1071_v16 = vld [vmem:[#allocation5 + $0x18] sm:$0xff] }
  0x1d   :  { %436 = vmatpush.bf16.msra.mxu3 %v1098_v3  ;;  %v1085_v17 = vld [vmem:[#allocation8 + $0x8] sm:$0xff]  ;;  %v1070_v19 = vld [vmem:[#allocation5 + $0x10] sm:$0xff]  ;;  %v1084_v20 = vld [vmem:[#allocation8] sm:$0xff] }
  0x1e   :  { %190 = vmatpush.bf16.msra.mxu0 %v1074_v7  ;;  %v1093_v18 = vld [vmem:[#allocation8 + $0x48] sm:$0xff]  ;;  %v1092_v21 = vld [vmem:[#allocation8 + $0x40] sm:$0xff]  ;;  %v286_v22 = vld [vmem:[#allocation2] sm:$0xff] }
  0x1f   :  { %v287_v23 = vld [vmem:[#allocation2 + $0x8] sm:$0xff]  ;;  %v1069_v24 = vld [vmem:[#allocation5 + $0x8] sm:$0xff]  ;;  %v288_v25 = vpack.c.bf16 %v286_v22, %v286_v22  ;;  %v1068_v27 = vld [vmem:[#allocation5] sm:$0xff] }
  0x20   :  { %424 = vmatpush.bf16.msra.mxu2 %v1089_v4  ;;  %v289_v26 = vpack.c.bf16 %v287_v23, %v287_v23  ;;  %v119_v28 = vld [vmem:[%s1528_s0] sm:$0xff]  ;;  %v1107_v29 = vld [vmem:[#allocation10 + $0x38] sm:$0xff]  ;;  %v1105_v32 = vld [vmem:[#allocation10 + $0x28] sm:$0xff]  ;;  %v1344_v23 = vmov 2131351028  }
  0x21   :  { %437 = vmatpush.bf16.msra.mxu3 %v1097_v5  ;;  %v120_v30 = vpack.c.bf16 %v119_v28, %v119_v28  ;;  %v1106_v31 = vld [vmem:[#allocation10 + $0x30] sm:$0xff]  ;;  %v1104_v33 = vld [vmem:[#allocation10 + $0x20] sm:$0xff]  ;;  %v1103_v34 = vld [vmem:[#allocation10 + $0x18] sm:$0xff] }
  0x22   :  { %191 = vmatpush.bf16.msra.mxu0 %v1073_v10  ;;  %v1102_v35 = vld [vmem:[#allocation10 + $0x10] sm:$0xff]  ;;  %v1101_v36 = vld [vmem:[#allocation10 + $0x8] sm:$0xff]  ;;  %v1100_v37 = vld [vmem:[#allocation10] sm:$0xff] }
  0x23   :  { %v1083_v38 = vld [vmem:[#allocation7 + $0x38] sm:$0xff]  ;;  %v1082_v39 = vld [vmem:[#allocation7 + $0x30] sm:$0xff]  ;;  %v1081_v42 = vld [vmem:[#allocation7 + $0x28] sm:$0xff] }
  0x24   :  { %425 = vmatpush.bf16.msra.mxu2 %v1088_v8  ;;  %272 = vmatpush.bf16.msra.mxu1 %v1083_v38  ;;  %v688_v41 = vld [vmem:[%s1530_s2] sm:$0xff]  ;;  %v1080_v43 = vld [vmem:[#allocation7 + $0x20] sm:$0xff]  ;;  %v1079_v44 = vld [vmem:[#allocation7 + $0x18] sm:$0xff] }
  0x25   :  { %438 = vmatpush.bf16.msra.mxu3 %v1096_v9  ;;  %846 = vperm.xlu0 %1125, %v688_v41   ;;  %v1078_v45 = vld [vmem:[#allocation7 + $0x10] sm:$0xff]  ;;  %v1077_v48 = vld [vmem:[#allocation7 + $0x8] sm:$0xff]  ;;  %v1076_v55 = vld [vmem:[#allocation7] sm:$0xff] }
  0x26   :  { %192 = vmatpush.bf16.msra.mxu0 %v1072_v13  ;;  %v1126_v46 = vld [vmem:[%s1536_s8] ss:$0 sm:$0xff] }
  0x27   :  { %v1127_v47 = vld [vmem:[%s1532_s4] ss:$0 sm:$0xff] }
  0x28   :  { %426 = vmatpush.bf16.msra.mxu2 %v1087_v11  ;;  %273 = vmatpush.bf16.msra.mxu1 %v1082_v39  ;;  %v1128_v63 = vld [vmem:[%s1538_s10] ss:$0 sm:$0xff]  ;;  %s881_s10 = sshll.u32 %s1541_s13, 4  ;;  %s882_s10 = int_to_ptr.hbm [resolvable:$true] %s881_s10 }
  0x29   :  { %439 = vmatpush.bf16.msra.mxu3 %v1095_v12  ;;  %v1129_v0 = vld [vmem:[%s1534_s6] ss:$0 sm:$0xff]  ;;  %s1348_s6 = smov [#allocation11]  }
  0x2a   :  { %193 = vmatpush.bf16.msra.mxu0 %v1071_v16  ;;  %s857_s12 = sshll.u32 %s1348_s6, 4  ;;  %s858_s12 = int_to_ptr.vmem [resolvable:$true] %s857_s12 }
  0x2c   :  { %427 = vmatpush.bf16.msra.mxu2 %v1086_v14  ;;  %274 = vmatpush.bf16.msra.mxu1 %v1081_v42 }
  0x2d   :  { %440 = vmatpush.bf16.msra.mxu3 %v1094_v15 }
  0x2e   :  { %194 = vmatpush.bf16.msra.mxu0 %v1070_v19 }
  0x30   :  { %428 = vmatpush.bf16.msra.mxu2 %v1085_v17  ;;  %275 = vmatpush.bf16.msra.mxu1 %v1080_v43 }
  0x31   :  { %441 = vmatpush.bf16.msra.mxu3 %v1093_v18  ;;  %v1342_v18 = vmov 683565275  }
  0x32   :  { %195 = vmatpush.bf16.msra.mxu0 %v1069_v24 }
  0x34   :  { %429 = vmatpush.bf16.msra.mxu2 %v1084_v20  ;;  %276 = vmatpush.bf16.msra.mxu1 %v1079_v44  ;;  %v1343_v20 = vmov 2475754826  }
  0x35   :  { %442 = vmatpush.bf16.msra.mxu3 %v1092_v21 }
  0x36   :  { %196 = vmatpush.bf16.msra.mxu0 %v1068_v27 }
  0x37   :  { %430 = vmatmul.bf16.vlgmr.msra.gmra.mxu2 %v288_v25 }
  0x38   :  { %443 = vmatmul.bf16.vlgmr.msra.gmra.mxu3 %v289_v26  ;;  %277 = vmatpush.bf16.msra.mxu1 %v1078_v45  ;;  %v1345_v26 = vmov 2102212464  }
  0x39   :  { %197 = vmatmul.bf16.vlgmr.msra.gmra.mxu0 %v120_v30 }
  0x3a   :  { %518 = vmatpush.bf16.msrb.mxu0 %v1107_v29  ;;  %v1346_v29 = vmov 920167782  }
  0x3c   :  { %278 = vmatpush.bf16.msra.mxu1 %v1077_v48 }
  0x3e   :  { %519 = vmatpush.bf16.msrb.mxu0 %v1106_v31 }
  0x40   :  { %279 = vmatpush.bf16.msra.mxu1 %v1076_v55 }
  0x42   :  { %520 = vmatpush.bf16.msrb.mxu0 %v1105_v32  ;;  %v1347_v32 = vmov 1326507024  }
  0x46   :  { %521 = vmatpush.bf16.msrb.mxu0 %v1104_v33 }
  0x4a   :  { %522 = vmatpush.bf16.msrb.mxu0 %v1103_v34 }
  0x4e   :  { %523 = vmatpush.bf16.msrb.mxu0 %v1102_v35 }
  0x52   :  { %524 = vmatpush.bf16.msrb.mxu0 %v1101_v36 }
  0x56   :  { %525 = vmatpush.bf16.msrb.mxu0 %v1100_v37 }
  0xb6   :  { %v198_v52 = vpop.f32.mrf.mxu0 }
  0xb7   :  { %v199_v53 = vadd.f32 %v1127_v47, %v198_v52 }
  0xb9   :  { %v202_v56 = vmax.f32 %v199_v53, 0.0 }
  0xba   :  { %v431_v49 = vpop.f32.mrf.mxu2 }
  0xbb   :  { %v444_v50 = vpop.f32.mrf.mxu3  ;;  %v432_v51 = vadd.f32 %v1126_v46, %v431_v49  ;;  %v203_v58 = vpack.c.bf16 %v202_v56, %v202_v56 }
  0xbd   :  { %v445_v54 = vadd.f32 %v444_v50, %v432_v51  ;;  %280 = vmatmul.bf16.vlgmr.msra.gmra.mxu1 %v203_v58 }
  0xbe   :  { %v200_v62 = vpop.f32.mrf.mxu0 }
  0xbf   :  { %v448_v57 = vmax.f32 %v445_v54, 0.0 }
  0xc1   :  { %v449_v59 = vpack.c.bf16 %v448_v57, %v448_v57 }
  0xc2   :  { %v433_v60 = vpop.f32.mrf.mxu2 }
  0xc3   :  { %v446_v61 = vpop.f32.mrf.mxu3  ;;  %526 = vmatmul.bf16.vlgmr.msrb.gmra.mxu0 %v449_v59 }
 0x13a   :  { %v281_v3 = vpop.f32.mrf.mxu1 }
 0x13b   :  { %v1461_v4 = vadd.f32 %v1129_v0, %v281_v3 }
 0x13d   :  { %285 = vst [vmem:[#allocation12] sm:$0xff] %v1461_v4 }
 0x13e   :  { %873 = dma.vmem_to_hbm [thread:$0]  %s869_s22, 128, %s871_s24, [#allocation13]  }
 0x140   :  { %v527_v1 = vpop.f32.mrf.mxu0 }
 0x141   :  { %v1456_v2 = vadd.f32 %v1128_v63, %v527_v1 }
 0x142   :  { %v283_v11 = vpop.f32.mrf.mxu1 }
 0x143   :  { %v535_v5 = vand.u32 2139095040, %v1456_v2  ;;  %531 = vst [vmem:[#allocation14] sm:$0xff] %v1456_v2  ;;  %v532_v9 = vand.u32 2147483647, %v1456_v2  ;;  %vm534_vm12 = vcmp.lt.s32.totalorder %v1456_v2, 0 }
 0x144   :  { %884 = dma.vmem_to_hbm [thread:$0]  %s880_s26, 128, %s882_s10, [#allocation13]  }
 0x145   :  { %v536_v6 = vshrl.u32 %v535_v5, 23  ;;  %v539_v13 = vand.u32 8388607, %v532_v9  ;;  %vm533_vm13 = vcmp.le.f32.partialorder %v532_v9, 0.7853982 }
 0x147   :  { %v1062_v7 = vadd.s32 4294967169, %v536_v6  ;;  %v540_v17 = vor.u32 8388608, %v539_v13 }
 0x148   :  { %v529_v8 = vpop.f32.mrf.mxu0 }
 0x149   :  { %v542_v10 = vadd.s32 1, %v1062_v7  ;;  %v1480_v39 = vshll.u32 %v540_v17, 8 }
 0x14b   :  { %vm543_vm0 = vcmp.gt.s32.totalorder %v542_v10, 0  ;;  %v581_v49 = vand.u32 65535, %v1480_v39  ;;  %v582_v50 = vshrl.u32 %v1480_v39, 16 }
 0x14c   :  { %v544_v12 = vsel %vm543_vm0, %v542_v10, 0 }
 0x14d   :  { %v546_v14 = vand.u32 31, %v544_v12  ;;  %v1471_v16 = vshrl.u32 %v544_v12, 5 }
 0x14f   :  { %v1469_v15 = vsub.s32 32, %v546_v14  ;;  %v549_v19 = vshll.u32 %v1342_v18, %v546_v14  ;;  %v552_v21 = vshll.u32 %v1343_v20, %v546_v14  ;;  %v555_v25 = vshll.u32 %v1344_v23, %v546_v14 }
 0x150   :  { %v558_v28 = vshll.u32 %v1345_v26, %v546_v14  ;;  %v561_v31 = vshll.u32 %v1346_v29, %v546_v14  ;;  %vm564_vm1 = vcmp.lt.s32.totalorder %v1471_v16, 1  ;;  %vm567_vm2 = vcmp.lt.s32.totalorder %v1471_v16, 4 }
 0x151   :  { %v550_v22 = vshrl.u32 %v1343_v20, %v1469_v15  ;;  %v553_v24 = vshrl.u32 %v1344_v23, %v1469_v15  ;;  %v556_v27 = vshrl.u32 %v1345_v26, %v1469_v15  ;;  %v559_v30 = vshrl.u32 %v1346_v29, %v1469_v15 }
 0x152   :  { %v562_v33 = vshrl.u32 %v1347_v32, %v1469_v15  ;;  %vm566_vm3 = vcmp.lt.s32.totalorder %v1471_v16, 3  ;;  %vm565_vm4 = vcmp.lt.s32.totalorder %v1471_v16, 2  ;;  %v548_v14 = vshrl.u32 %v1342_v18, %v1469_v15 }
 0x153   :  { %v551_v34 = vor.u32 %v550_v22, %v549_v19  ;;  %v554_v35 = vor.u32 %v553_v24, %v552_v21  ;;  %v557_v36 = vor.u32 %v556_v27, %v555_v25  ;;  %v560_v37 = vor.u32 %v559_v30, %v558_v28 }
 0x154   :  { %v563_v38 = vor.u32 %v562_v33, %v561_v31 }
 0x155   :  { %v572_v41 = vsel %vm564_vm1, %v551_v34, %v554_v35  ;;  %v576_v42 = vsel %vm564_vm1, %v554_v35, %v557_v36  ;;  %v573_v43 = vsel %vm567_vm2, %v560_v37, 920167782  ;;  %v569_v11 = vsel %vm567_vm2, %v557_v36, 2102212464 }
 0x156   :  { %v577_v44 = vsel %vm567_vm2, %v563_v38, 1326507024  ;;  %v574_v45 = vsel %vm566_vm3, %v557_v36, %v573_v43  ;;  %v568_v23 = vsel %vm564_vm1, %v548_v14, %v551_v34  ;;  %v570_v24 = vsel %vm566_vm3, %v554_v35, %v569_v11 }
 0x157   :  { %v578_v46 = vsel %vm566_vm3, %v560_v37, %v577_v44  ;;  %v575_v47 = vsel %vm565_vm4, %v572_v41, %v574_v45  ;;  %v571_v15 = vsel %vm565_vm4, %v568_v23, %v570_v24 }
 0x158   :  { %v579_v48 = vsel %vm565_vm4, %v576_v42, %v578_v46  ;;  %v605_v53 = vand.u32 65535, %v575_v47  ;;  %v606_v54 = vshrl.u32 %v575_v47, 16  ;;  %v625_v31 = vmul.u32 %v1480_v39, %v571_v15 }
 0x159   :  { %v583_v51 = vand.u32 65535, %v579_v48  ;;  %v584_v52 = vshrl.u32 %v579_v48, 16  ;;  %vm675_vm4 = vweird.f32 %v1456_v2 }
 0x15a   :  { %v608_v57 = vmul.u32 %v606_v54, %v581_v49  ;;  %v609_v58 = vmul.u32 %v605_v53, %v582_v50  ;;  %v607_v62 = vmul.u32 %v605_v53, %v581_v49  ;;  %v610_v3 = vmul.u32 %v606_v54, %v582_v50 }
 0x15b   :  { %v586_v55 = vmul.u32 %v584_v52, %v581_v49  ;;  %v587_v56 = vmul.u32 %v583_v51, %v582_v50  ;;  %v585_v59 = vmul.u32 %v583_v51, %v581_v49  ;;  %v588_v61 = vmul.u32 %v584_v52, %v582_v50 }
 0x15c   :  { %v611_v63 = vshll.u32 %v608_v57, 16  ;;  %v613_v6 = vshll.u32 %v609_v58, 16  ;;  %v612_v21 = vshrl.u32 %v608_v57, 16  ;;  %v614_v27 = vshrl.u32 %v609_v58, 16 }
 0x15d   :  { %v589_v60 = vshll.u32 %v586_v55, 16  ;;  %v591_v0 = vshll.u32 %v587_v56, 16  ;;  %v590_v17 = vshrl.u32 %v586_v55, 16  ;;  %v592_v25 = vshrl.u32 %v587_v56, 16 }
 0x15e   :  { %vm615_vm6 = vc.u32 %v607_v62, %v611_v63  ;;  %v617_v7 = vadd.s32 %v611_v63, %v607_v62 }
 0x15f   :  { %vm593_vm5 = vc.u32 %v585_v59, %v589_v60  ;;  %v595_v1 = vadd.s32 %v589_v60, %v585_v59  ;;  %v616_v10 = vsel %vm615_vm6, 1, %v1339_v40 }
 0x160   :  { %v594_v5 = vsel %vm593_vm5, 1, %v1339_v40  ;;  %v618_v13 = vadd.s32 %v616_v10, %v610_v3  ;;  %vm619_vm8 = vc.u32 %v617_v7, %v613_v6  ;;  %v621_v30 = vadd.s32 %v617_v7, %v613_v6 }
 0x161   :  { %v596_v8 = vadd.s32 %v594_v5, %v588_v61  ;;  %vm597_vm7 = vc.u32 %v595_v1, %v591_v0  ;;  %v620_v20 = vsel %vm619_vm8, 1, %v1339_v40 }
 0x162   :  { %v598_v12 = vsel %vm597_vm7, 1, %v1339_v40  ;;  %v622_v22 = vadd.s32 %v620_v20, %v618_v13 }
 0x163   :  { %v600_v19 = vadd.s32 %v598_v12, %v596_v8 }
 0x164   :  { %v623_v28 = vadd.s32 %v622_v22, %v612_v21  ;;  %v847_v21 = vpop.permute.xlu0 %846 }
 0x165   :  { %v601_v26 = vadd.s32 %v600_v19, %v590_v17 }
 0x166   :  { %v624_v18 = vadd.s32 %v623_v28, %v614_v27 }
 0x167   :  { %v602_v29 = vadd.s32 %v601_v26, %v592_v25 }
 0x168   :  { %v628_v40 = vadd.s32 1, %v624_v18 }
 0x169   :  { %vm627_vm9 = vc.u32 %v602_v29, %v621_v30  ;;  %v626_v16 = vadd.s32 %v621_v30, %v602_v29 }
 0x16a   :  { %v629_v32 = vsel %vm627_vm9, %v628_v40, %v624_v18 }
 0x16b   :  { %v630_v33 = vadd.s32 %v629_v32, %v625_v31 }
 0x16d   :  { %v631_v34 = vadd.s32 536870912, %v630_v33 }
 0x16f   :  { %v632_v36 = vshrl.u32 %v631_v34, 30 }
 0x171   :  { %v633_v37 = vshll.u32 %v632_v36, 30  ;;  %v656_v57 = vsub.s32 4, %v632_v36 }
 0x173   :  { %v634_v35 = vsub.s32 %v630_v33, %v633_v37  ;;  %v657_v62 = vsel %vm534_vm12, %v656_v57, %v632_v36 }
 0x174   :  { %v659_v1 = vsel %vm533_vm13, 0, %v657_v62 }
 0x175   :  { %vm635_vm10 = vcmp.lt.s32.totalorder %v634_v35, 0  ;;  %v636_v38 = vsub.s32 0, %v634_v35  ;;  %v833_v8 = vadd.s32 3, %v659_v1  ;;  %v676_v13 = vand.u32 3, %v659_v1 }
 0x177   :  { %v637_v41 = vsel %vm635_vm10, %v636_v38, %v634_v35  ;;  %v834_v14 = vand.u32 3, %v833_v8  ;;  %vm677_vm14 = vcmp.lt.s32.totalorder %v676_v13, 2  ;;  %vm678_vm15 = vcmp.eq.s32.totalorder %v676_v13, 0 }
 0x178   :  { %v638_v42 = vclz %v637_v41  ;;  %vm681_vm0 = vcmp.eq.s32.totalorder %v676_v13, 2 }
 0x179   :  { %vm835_vm1 = vcmp.lt.s32.totalorder %v834_v14, 2  ;;  %vm836_vm2 = vcmp.eq.s32.totalorder %v834_v14, 0  ;;  %vm839_vm3 = vcmp.eq.s32.totalorder %v834_v14, 2 }
 0x17a   :  { %v1063_v43 = vadd.s32 4294967294, %v638_v42 }
 0x17c   :  { %vm1064_vm11 = vcmp.lt.s32.totalorder %v1063_v43, 0 }
 0x17d   :  { %v641_v44 = vsel %vm1064_vm11, 0, %v1063_v43 }
 0x17e   :  { %v642_v45 = vsub.s32 32, %v641_v44  ;;  %v646_v46 = vsub.s32 4294967266, %v641_v44  ;;  %v643_v47 = vshll.u32 %v634_v35, %v641_v44 }
 0x180   :  { %v644_v48 = vshrl.u32 %v626_v16, %v642_v45  ;;  %v647_v49 = vadd.s32 127, %v646_v46 }
 0x182   :  { %v645_v39 = vor.u32 %v644_v48, %v643_v47  ;;  %v648_v50 = vshll.u32 %v647_v49, 23 }
 0x184   :  { %v649_v51 = vor.u32 4788187, %v648_v50  ;;  %v652_v53 = vcvt.s32.f32 %v645_v39 }
 0x186   :  { %v650_v52 = vand.u32 2147483647, %v649_v51 }
 0x188   :  { %v653_v54 = vmul.f32 %v652_v53, %v650_v52 }
 0x18a   :  { %v654_v55 = vxor.u32 2147483648, %v653_v54 }
 0x18c   :  { %v655_v56 = vsel %vm534_vm12, %v654_v55, %v653_v54 }
 0x18d   :  { %v658_v58 = vsel %vm533_vm13, %v1456_v2, %v655_v56 }
 0x18e   :  { %v660_v59 = vmul.f32 %v658_v58, %v658_v58 }
 0x190   :  { %v661_v60 = vmul.f32 -0.001358992, %v660_v59  ;;  %v668_v61 = vmul.f32 -0.00019511016, %v660_v59 }
 0x192   :  { %v662_v63 = vadd.f32 0.041655596, %v661_v60  ;;  %v669_v0 = vadd.f32 0.008332121, %v668_v61 }
 0x194   :  { %v663_v3 = vmul.f32 %v662_v63, %v660_v59  ;;  %v670_v5 = vmul.f32 %v669_v0, %v660_v59 }
 0x196   :  { %v664_v6 = vadd.f32 -0.4999988, %v663_v3  ;;  %v671_v7 = vadd.f32 -0.16666654, %v670_v5 }
 0x198   :  { %v665_v10 = vmul.f32 %v664_v6, %v660_v59  ;;  %v672_v11 = vmul.f32 %v671_v7, %v660_v59 }
 0x19a   :  { %v666_v12 = vadd.f32 1.0, %v665_v10  ;;  %v673_v9 = vadd.f32 1.0, %v672_v11 }
 0x19c   :  { %v674_v17 = vmul.f32 %v673_v9, %v658_v58  ;;  %v682_v19 = vxor.u32 2147483648, %v666_v12 }
 0x19e   :  { %v679_v20 = vxor.u32 2147483648, %v674_v17  ;;  %v683_v23 = vsel %vm681_vm0, %v682_v19, %v674_v17  ;;  %v841_v25 = vsel %vm839_vm3, %v682_v19, %v674_v17 }
 0x1a0   :  { %v680_v22 = vsel %vm678_vm15, %v666_v12, %v679_v20  ;;  %v838_v24 = vsel %vm836_vm2, %v666_v12, %v679_v20 }
 0x1a1   :  { %v684_v26 = vsel %vm677_vm14, %v680_v22, %v683_v23  ;;  %v842_v27 = vsel %vm835_vm1, %v838_v24, %v841_v25 }
 0x1a2   :  { %v685_v28 = vsel %vm675_vm4, nan, %v684_v26  ;;  %v843_v29 = vsel %vm675_vm4, nan, %v842_v27 }
 0x1a3   :  { %v686_v30 = vmul.f32 %v685_v28, %v1461_v4  ;;  %v849_v15 = vmul.f32 %v847_v21, %v843_v29 }
 0x1a5   :  { %v850_v18 = vmul.f32 %v849_v15, %v1461_v4  ;;  %687 = vst [vmem:[#allocation11] sm:$0xff] %v686_v30 }
 0x1a7   :  { %851 = vst [vmem:[#allocation11 + $0x8] sm:$0xff] %v850_v18 }
 0x1a8   :  { %862 = dma.vmem_to_hbm [thread:$0]  %s858_s12, 256, %s860_s29, [#allocation4]  }
 0x1a9   :  { %1328 = dma.done.wait [#allocation4], 256  }
 0x1aa   :  { %1329 = vsyncadd [#allocation4], 4294967040 }
 0x1ab   :  { %1330 = dma.done.wait [#allocation13], 256  }
 0x1ac   :  { %1331 = vsyncadd [#allocation13], 4294967040 }
 0x1ad   :  { %897 = vsyncpa [#allocation3], 1 }
 0x1ae   :  { %898 = vsyncpa [#allocation6], 1 }
 0x1af   :  { %899 = vsyncpa [#allocation9], 1 }
 0x1b0   :  { %900 = vsyncpa [#allocation4], 1 }
 0x1b1   :  { %901 = vsyncpa [#allocation13], 1 }

</bundles_post_ra>
